<compile_context>
chip_gen: v5e
topology: v5e:2x2
jax: 0.10.0
libtpu: 0.0.40
codegen_flags: <defaults>
</compile_context>

<pallas_src>
import functools

import numpy as np
import jax
import jax.numpy as jnp
from jax.experimental import pallas as pl
from jax.experimental.pallas import tpu as pltpu


# ----------------------------------------------------------------------------
# Fused kernel: all TemporalBlocks + regressor in one pallas_call
# ----------------------------------------------------------------------------
def _fused_tcn_kernel(*refs, block_meta, k, L, B):
    """refs = (pos, x, [per block: w1, b1, w2, b2, (wd, bd)], w_reg_full, sel, b_reg, out).

    Layouts:
      pos        (1, B*L)  int32, position of each lane within its length-L sequence
      x          (C0, B*L) f32, channels on sublanes, batch folded onto lanes
      w1/w2      (k, C_out, C_in) f32 conv taps
      b*, bd     (C_out, 1)
      wd         (C_out, C_in) 1x1 downsample (optional per block)
      w_reg_full (C_last, B*L)  regressor weights tiled across batch segments
      sel        (B*L, B)       segment-selector (1.0 where lane belongs to batch b)
      b_reg      (1, 1)
      out        (1, B)
    """
    out_ref = refs[-1]
    pos = refs[0][...]          # (1, B*L) int32
    h = refs[1][...]            # (C0, B*L) f32
    BL = B * L
    idx = 2

    def shift_tap(hcur, shift):
        # tap[:, l] = hcur[:, l - shift] within the same length-L segment, else 0.
        if shift == 0:
            return hcur
        if shift >= L:
            return jnp.zeros_like(hcur)
        # Lane roll toward higher indices (wrap content is masked out below).
        rolled = jnp.concatenate(
            [hcur[:, BL - shift:], hcur[:, :BL - shift]], axis=1)
        return jnp.where(pos >= shift, rolled, 0.0)

    def causal_conv(hcur, w_ref, b_ref, d):
        # out[:, t] = sum_j W[j] @ hcur[:, t - (k-1-j)*d]  (zero-padded / causal)
        acc = None
        for j in range(k):
            tap = shift_tap(hcur, (k - 1 - j) * d)
            part = jnp.dot(w_ref[j], tap, preferred_element_type=jnp.float32)
            acc = part if acc is None else acc + part
        return acc + b_ref[...]          # bias (C_out, 1) broadcasts over lanes

    for (dilation, has_ds) in block_meta:
        w1, b1, w2, b2 = refs[idx], refs[idx + 1], refs[idx + 2], refs[idx + 3]
        idx += 4
        h1 = jnp.maximum(causal_conv(h, w1, b1, dilation), 0.0)     # conv1 + relu
        h2 = jnp.maximum(causal_conv(h1, w2, b2, dilation), 0.0)    # conv2 + relu
        if has_ds:
            wd, bd = refs[idx], refs[idx + 1]
            idx += 2
            res = jnp.dot(wd[...], h, preferred_element_type=jnp.float32) + bd[...]
        else:
            res = h
        h = jnp.maximum(h2 + res, 0.0)                              # residual + relu

    # Fused regressor: out[b] = sum_{c,t} h[c, b*L+t] * w_reg[c*L+t] + b_reg
    w_reg_full = refs[idx][...]       # (C_last, B*L)
    sel = refs[idx + 1][...]          # (B*L, B)
    b_reg = refs[idx + 2][...]        # (1, 1)
    v = jnp.sum(h * w_reg_full, axis=0, keepdims=True)              # (1, B*L)
    out_ref[...] = jnp.dot(v, sel, preferred_element_type=jnp.float32) + b_reg


# ----------------------------------------------------------------------------
# Full module forward (host wrapper: layout prep only, single pallas_call)
# ----------------------------------------------------------------------------
def fast_vth_search_block(x, params, *, num_inputs, kernel_size):
    # torch: (B, L) -> (B, 1, 1, L)  or  (B, C, L) -> (B, C, 1, L); H=1 is dropped
    # and the batch is folded onto the lane axis: activations live as (C, B*L).
    if num_inputs == 1:
        B, L = x.shape
        h0 = x.reshape(1, B * L)
    else:
        B, c0, L = x.shape
        h0 = jnp.transpose(x, (1, 0, 2)).reshape(c0, B * L)
    BL = B * L

    # Lane position within its length-L sequence (constant, precomputed host-side).
    pos = jnp.asarray(np.tile(np.arange(L, dtype=np.int32), B).reshape(1, BL))

    inputs = [pos, h0]
    block_meta = []
    c_last = num_inputs
    for i, blk in enumerate(params["blocks"]):
        dilation = 2 ** i
        _, c_out, _ = blk["w1"].shape
        inputs += [blk["w1"], blk["b1"].reshape(c_out, 1),
                   blk["w2"], blk["b2"].reshape(c_out, 1)]
        has_ds = blk["wd"] is not None
        if has_ds:
            inputs += [blk["wd"], blk["bd"].reshape(c_out, 1)]
        block_meta.append((dilation, has_ds))
        c_last = c_out

    # Regressor weights: (C_last*L, 1) -> (C_last, L) -> tiled over batch segments.
    w2d = params["w_reg"].reshape(c_last, L)
    w_reg_full = jnp.tile(w2d, (1, B))                                  # (C_last, B*L)
    sel_np = np.zeros((BL, B), dtype=np.float32)
    for b in range(B):
        sel_np[b * L:(b + 1) * L, b] = 1.0
    inputs += [w_reg_full, jnp.asarray(sel_np), params["b_reg"].reshape(1, 1)]

    kernel = functools.partial(
        _fused_tcn_kernel,
        block_meta=tuple(block_meta),
        k=kernel_size, L=L, B=B,
    )
    # No grid, no BlockSpecs: every (tiny) operand is placed whole in VMEM.
    out = pl.pallas_call(
        kernel,
        out_shape=jax.ShapeDtypeStruct((1, B), jnp.float32),
    )(*inputs)
    return out.reshape(B, 1)


# ----------------------------------------------------------------------------
# Deterministic parameter init (synthetic; shapes follow the torch module)
# ----------------------------------------------------------------------------
def init_params(key, num_seq, num_inputs, num_channels, kernel_size):
    blocks = []
    c_in = num_inputs
    for c_out in num_channels:
        key, k1, k2, k3, k4, k5, k6 = jax.random.split(key, 7)
        w1 = 0.5 * jax.random.normal(k1, (kernel_size, c_out, c_in), jnp.float32)
        b1 = 0.1 * jax.random.normal(k2, (c_out,), jnp.float32)
        w2 = 0.5 * jax.random.normal(k3, (kernel_size, c_out, c_out), jnp.float32)
        b2 = 0.1 * jax.random.normal(k4, (c_out,), jnp.float32)
        if c_in != c_out:
            wd = 0.5 * jax.random.normal(k5, (c_out, c_in), jnp.float32)
            bd = 0.1 * jax.random.normal(k6, (c_out,), jnp.float32)
        else:
            wd, bd = None, None
        blocks.append(dict(w1=w1, b1=b1, w2=w2, b2=b2, wd=wd, bd=bd))
        c_in = c_out
    key, kw, kb = jax.random.split(key, 3)
    feat = num_channels[-1] * num_seq
    w_reg = 0.1 * jax.random.normal(kw, (feat, 1), jnp.float32)
    b_reg = 0.1 * jax.random.normal(kb, (1,), jnp.float32)
    return dict(blocks=blocks, w_reg=w_reg, b_reg=b_reg)


# ----------------------------------------------------------------------------
# Pure-JAX reference (for correctness check only)
# ----------------------------------------------------------------------------
def ref_forward(x, params, *, num_inputs, kernel_size):
    if num_inputs == 1:
        h = x[:, None, None, :]  # (B, 1, 1, L)
    else:
        h = x[:, :, None, :]     # (B, C, 1, L)
    for i, blk in enumerate(params["blocks"]):
        d = 2 ** i
        pad = (kernel_size - 1) * d

        def conv(inp, w_kcoci, b):
            w = jnp.transpose(w_kcoci, (1, 2, 0))[:, :, None, :]  # (C_out, C_in, 1, k)
            inp_p = jnp.pad(inp, ((0, 0), (0, 0), (0, 0), (pad, 0)))
            y = jax.lax.conv_general_dilated(
                inp_p, w, window_strides=(1, 1), padding="VALID",
                rhs_dilation=(d, d), dimension_numbers=("NCHW", "OIHW", "NCHW"),
            )
            return y + b[None, :, None, None]

        out = jax.nn.relu(conv(h, blk["w1"], blk["b1"]))
        out = jax.nn.relu(conv(out, blk["w2"], blk["b2"]))
        if blk["wd"] is not None:
            res = jnp.einsum("oc,bchl->bohl", blk["wd"], h) + blk["bd"][None, :, None, None]
        else:
            res = h
        h = jax.nn.relu(out + res)
    B = h.shape[0]
    flat = h.reshape(B, -1)
    return flat @ params["w_reg"] + params["b_reg"]


if __name__ == "__main__":
    B = 2
    num_seq = 16
    num_inputs = 1
    num_channels = [4, 4]   # block 0 has a 1x1 downsample (1 -> 4), block 1 does not (4 -> 4)
    kernel_size = 2
    dropout = 0.2           # defined but unused in the torch forward; no-op here as well

    key = jax.random.PRNGKey(0)
    key, kp, kx = jax.random.split(key, 3)
    params = init_params(kp, num_seq, num_inputs, num_channels, kernel_size)
    x = jax.random.normal(kx, (B, num_seq), jnp.float32)

    fwd = jax.jit(functools.partial(
        fast_vth_search_block, num_inputs=num_inputs, kernel_size=kernel_size))
    out = jax.block_until_ready(fwd(x, params))

    ref = jax.block_until_ready(
        ref_forward(x, params, num_inputs=num_inputs, kernel_size=kernel_size))

    assert out.shape == (B, 1), out.shape
    assert np.allclose(np.asarray(out), np.asarray(ref), rtol=1e-4, atol=1e-5), (out, ref)
    print("KERNEL_OK")
</pallas_src>

<mosaic_0001>
module attributes {stable_mosaic.version = 11 : i64} {
  func.func @_fused_tcn_kernel(%arg0: memref<1x32xi32, #tpu.memory_space<vmem>>, %arg1: memref<1x32xf32, #tpu.memory_space<vmem>>, %arg2: memref<2x4x1xf32, #tpu.memory_space<vmem>>, %arg3: memref<4x1xf32, #tpu.memory_space<vmem>>, %arg4: memref<2x4x4xf32, #tpu.memory_space<vmem>>, %arg5: memref<4x1xf32, #tpu.memory_space<vmem>>, %arg6: memref<4x1xf32, #tpu.memory_space<vmem>>, %arg7: memref<4x1xf32, #tpu.memory_space<vmem>>, %arg8: memref<2x4x4xf32, #tpu.memory_space<vmem>>, %arg9: memref<4x1xf32, #tpu.memory_space<vmem>>, %arg10: memref<2x4x4xf32, #tpu.memory_space<vmem>>, %arg11: memref<4x1xf32, #tpu.memory_space<vmem>>, %arg12: memref<4x32xf32, #tpu.memory_space<vmem>>, %arg13: memref<32x2xf32, #tpu.memory_space<vmem>>, %arg14: memref<1x1xf32, #tpu.memory_space<vmem>>, %arg15: memref<1x2xf32, #tpu.memory_space<vmem>>) attributes {dimension_semantics = [], scalar_prefetch = 0 : i64, scratch_operands = 0 : i64, tpu.core_type = #tpu.core_type<tc>} {
    %c0 = arith.constant 0 : index
    %c0_0 = arith.constant 0 : index
    %0 = vector.load %arg0[%c0, %c0_0] : memref<1x32xi32, #tpu.memory_space<vmem>>, vector<1x32xi32>
    %c0_1 = arith.constant 0 : index
    %c0_2 = arith.constant 0 : index
    %1 = vector.load %arg1[%c0_1, %c0_2] : memref<1x32xf32, #tpu.memory_space<vmem>>, vector<1x32xf32>
    %2 = vector.extract_strided_slice %1 {offsets = [0, 31], sizes = [1, 1], strides = [1, 1]} : vector<1x32xf32> to vector<1x1xf32>
    %3 = vector.extract_strided_slice %1 {offsets = [0, 0], sizes = [1, 31], strides = [1, 1]} : vector<1x32xf32> to vector<1x31xf32>
    %4 = tpu.concatenate %2, %3 in 1 : vector<1x1xf32>, vector<1x31xf32> -> vector<1x32xf32>
    %c1_i32 = arith.constant 1 : i32
    %5 = vector.broadcast %c1_i32 : i32 to vector<1x32xi32>
    %6 = arith.cmpi sge, %0, %5 : vector<1x32xi32>
    %cst = arith.constant 0.000000e+00 : f32
    %7 = vector.broadcast %cst : f32 to vector<1x32xf32>
    %8 = arith.select %6, %4, %7 : vector<1x32xi1>, vector<1x32xf32>
    %c0_3 = arith.constant 0 : index
    %c0_4 = arith.constant 0 : index
    %c0_5 = arith.constant 0 : index
    %9 = vector.load %arg2[%c0_3, %c0_4, %c0_5] : memref<2x4x1xf32, #tpu.memory_space<vmem>>, vector<1x4x1xf32>
    %10 = vector.shape_cast %9 : vector<1x4x1xf32> to vector<4x1xf32>
    %cst_6 = arith.constant dense<0.000000e+00> : vector<4x32xf32>
    %11 = tpu.matmul %10, %8, %cst_6 {dimension_numbers = #tpu.dot_dimension_numbers<[1], [0], [0], [1], [0, 0, 1, 1], [], []>} : vector<4x1xf32>, vector<1x32xf32>, vector<4x32xf32> -> vector<4x32xf32>
    %c1 = arith.constant 1 : index
    %c0_7 = arith.constant 0 : index
    %c0_8 = arith.constant 0 : index
    %12 = vector.load %arg2[%c1, %c0_7, %c0_8] : memref<2x4x1xf32, #tpu.memory_space<vmem>>, vector<1x4x1xf32>
    %13 = vector.shape_cast %12 : vector<1x4x1xf32> to vector<4x1xf32>
    %cst_9 = arith.constant dense<0.000000e+00> : vector<4x32xf32>
    %14 = tpu.matmul %13, %1, %cst_9 {dimension_numbers = #tpu.dot_dimension_numbers<[1], [0], [0], [1], [0, 0, 1, 1], [], []>} : vector<4x1xf32>, vector<1x32xf32>, vector<4x32xf32> -> vector<4x32xf32>
    %15 = arith.addf %11, %14 : vector<4x32xf32>
    %c0_10 = arith.constant 0 : index
    %c0_11 = arith.constant 0 : index
    %16 = vector.load %arg3[%c0_10, %c0_11] : memref<4x1xf32, #tpu.memory_space<vmem>>, vector<4x1xf32>
    %17 = vector.broadcast %16 : vector<4x1xf32> to vector<4x32xf32>
    %18 = arith.addf %15, %17 : vector<4x32xf32>
    %cst_12 = arith.constant 0.000000e+00 : f32
    %19 = vector.broadcast %cst_12 : f32 to vector<4x32xf32>
    %20 = arith.maximumf %18, %19 : vector<4x32xf32>
    %21 = vector.extract_strided_slice %20 {offsets = [0, 31], sizes = [4, 1], strides = [1, 1]} : vector<4x32xf32> to vector<4x1xf32>
    %22 = vector.extract_strided_slice %20 {offsets = [0, 0], sizes = [4, 31], strides = [1, 1]} : vector<4x32xf32> to vector<4x31xf32>
    %23 = tpu.concatenate %21, %22 in 1 : vector<4x1xf32>, vector<4x31xf32> -> vector<4x32xf32>
    %c1_i32_13 = arith.constant 1 : i32
    %24 = vector.broadcast %c1_i32_13 : i32 to vector<1x32xi32>
    %25 = arith.cmpi sge, %0, %24 : vector<1x32xi32>
    %cst_14 = arith.constant 0.000000e+00 : f32
    %26 = vector.shape_cast %25 : vector<1x32xi1> to vector<1x32xi1>
    %27 = vector.broadcast %26 : vector<1x32xi1> to vector<4x32xi1>
    %28 = vector.broadcast %cst_14 : f32 to vector<4x32xf32>
    %29 = arith.select %27, %23, %28 : vector<4x32xi1>, vector<4x32xf32>
    %c0_15 = arith.constant 0 : index
    %c0_16 = arith.constant 0 : index
    %c0_17 = arith.constant 0 : index
    %30 = vector.load %arg4[%c0_15, %c0_16, %c0_17] : memref<2x4x4xf32, #tpu.memory_space<vmem>>, vector<1x4x4xf32>
    %31 = vector.shape_cast %30 : vector<1x4x4xf32> to vector<4x4xf32>
    %cst_18 = arith.constant dense<0.000000e+00> : vector<4x32xf32>
    %32 = tpu.matmul %31, %29, %cst_18 {dimension_numbers = #tpu.dot_dimension_numbers<[1], [0], [0], [1], [0, 0, 1, 1], [], []>} : vector<4x4xf32>, vector<4x32xf32>, vector<4x32xf32> -> vector<4x32xf32>
    %c1_19 = arith.constant 1 : index
    %c0_20 = arith.constant 0 : index
    %c0_21 = arith.constant 0 : index
    %33 = vector.load %arg4[%c1_19, %c0_20, %c0_21] : memref<2x4x4xf32, #tpu.memory_space<vmem>>, vector<1x4x4xf32>
    %34 = vector.shape_cast %33 : vector<1x4x4xf32> to vector<4x4xf32>
    %cst_22 = arith.constant dense<0.000000e+00> : vector<4x32xf32>
    %35 = tpu.matmul %34, %20, %cst_22 {dimension_numbers = #tpu.dot_dimension_numbers<[1], [0], [0], [1], [0, 0, 1, 1], [], []>} : vector<4x4xf32>, vector<4x32xf32>, vector<4x32xf32> -> vector<4x32xf32>
    %36 = arith.addf %32, %35 : vector<4x32xf32>
    %c0_23 = arith.constant 0 : index
    %c0_24 = arith.constant 0 : index
    %37 = vector.load %arg5[%c0_23, %c0_24] : memref<4x1xf32, #tpu.memory_space<vmem>>, vector<4x1xf32>
    %38 = vector.broadcast %37 : vector<4x1xf32> to vector<4x32xf32>
    %39 = arith.addf %36, %38 : vector<4x32xf32>
    %cst_25 = arith.constant 0.000000e+00 : f32
    %40 = vector.broadcast %cst_25 : f32 to vector<4x32xf32>
    %41 = arith.maximumf %39, %40 : vector<4x32xf32>
    %c0_26 = arith.constant 0 : index
    %c0_27 = arith.constant 0 : index
    %42 = vector.load %arg6[%c0_26, %c0_27] : memref<4x1xf32, #tpu.memory_space<vmem>>, vector<4x1xf32>
    %cst_28 = arith.constant dense<0.000000e+00> : vector<4x32xf32>
    %43 = tpu.matmul %42, %1, %cst_28 {dimension_numbers = #tpu.dot_dimension_numbers<[1], [0], [0], [1], [0, 0, 1, 1], [], []>} : vector<4x1xf32>, vector<1x32xf32>, vector<4x32xf32> -> vector<4x32xf32>
    %c0_29 = arith.constant 0 : index
    %c0_30 = arith.constant 0 : index
    %44 = vector.load %arg7[%c0_29, %c0_30] : memref<4x1xf32, #tpu.memory_space<vmem>>, vector<4x1xf32>
    %45 = vector.broadcast %44 : vector<4x1xf32> to vector<4x32xf32>
    %46 = arith.addf %43, %45 : vector<4x32xf32>
    %47 = arith.addf %41, %46 : vector<4x32xf32>
    %cst_31 = arith.constant 0.000000e+00 : f32
    %48 = vector.broadcast %cst_31 : f32 to vector<4x32xf32>
    %49 = arith.maximumf %47, %48 : vector<4x32xf32>
    %50 = vector.extract_strided_slice %49 {offsets = [0, 30], sizes = [4, 2], strides = [1, 1]} : vector<4x32xf32> to vector<4x2xf32>
    %51 = vector.extract_strided_slice %49 {offsets = [0, 0], sizes = [4, 30], strides = [1, 1]} : vector<4x32xf32> to vector<4x30xf32>
    %52 = tpu.concatenate %50, %51 in 1 : vector<4x2xf32>, vector<4x30xf32> -> vector<4x32xf32>
    %c2_i32 = arith.constant 2 : i32
    %53 = vector.broadcast %c2_i32 : i32 to vector<1x32xi32>
    %54 = arith.cmpi sge, %0, %53 : vector<1x32xi32>
    %cst_32 = arith.constant 0.000000e+00 : f32
    %55 = vector.shape_cast %54 : vector<1x32xi1> to vector<1x32xi1>
    %56 = vector.broadcast %55 : vector<1x32xi1> to vector<4x32xi1>
    %57 = vector.broadcast %cst_32 : f32 to vector<4x32xf32>
    %58 = arith.select %56, %52, %57 : vector<4x32xi1>, vector<4x32xf32>
    %c0_33 = arith.constant 0 : index
    %c0_34 = arith.constant 0 : index
    %c0_35 = arith.constant 0 : index
    %59 = vector.load %arg8[%c0_33, %c0_34, %c0_35] : memref<2x4x4xf32, #tpu.memory_space<vmem>>, vector<1x4x4xf32>
    %60 = vector.shape_cast %59 : vector<1x4x4xf32> to vector<4x4xf32>
    %cst_36 = arith.constant dense<0.000000e+00> : vector<4x32xf32>
    %61 = tpu.matmul %60, %58, %cst_36 {dimension_numbers = #tpu.dot_dimension_numbers<[1], [0], [0], [1], [0, 0, 1, 1], [], []>} : vector<4x4xf32>, vector<4x32xf32>, vector<4x32xf32> -> vector<4x32xf32>
    %c1_37 = arith.constant 1 : index
    %c0_38 = arith.constant 0 : index
    %c0_39 = arith.constant 0 : index
    %62 = vector.load %arg8[%c1_37, %c0_38, %c0_39] : memref<2x4x4xf32, #tpu.memory_space<vmem>>, vector<1x4x4xf32>
    %63 = vector.shape_cast %62 : vector<1x4x4xf32> to vector<4x4xf32>
    %cst_40 = arith.constant dense<0.000000e+00> : vector<4x32xf32>
    %64 = tpu.matmul %63, %49, %cst_40 {dimension_numbers = #tpu.dot_dimension_numbers<[1], [0], [0], [1], [0, 0, 1, 1], [], []>} : vector<4x4xf32>, vector<4x32xf32>, vector<4x32xf32> -> vector<4x32xf32>
    %65 = arith.addf %61, %64 : vector<4x32xf32>
    %c0_41 = arith.constant 0 : index
    %c0_42 = arith.constant 0 : index
    %66 = vector.load %arg9[%c0_41, %c0_42] : memref<4x1xf32, #tpu.memory_space<vmem>>, vector<4x1xf32>
    %67 = vector.broadcast %66 : vector<4x1xf32> to vector<4x32xf32>
    %68 = arith.addf %65, %67 : vector<4x32xf32>
    %cst_43 = arith.constant 0.000000e+00 : f32
    %69 = vector.broadcast %cst_43 : f32 to vector<4x32xf32>
    %70 = arith.maximumf %68, %69 : vector<4x32xf32>
    %71 = vector.extract_strided_slice %70 {offsets = [0, 30], sizes = [4, 2], strides = [1, 1]} : vector<4x32xf32> to vector<4x2xf32>
    %72 = vector.extract_strided_slice %70 {offsets = [0, 0], sizes = [4, 30], strides = [1, 1]} : vector<4x32xf32> to vector<4x30xf32>
    %73 = tpu.concatenate %71, %72 in 1 : vector<4x2xf32>, vector<4x30xf32> -> vector<4x32xf32>
    %c2_i32_44 = arith.constant 2 : i32
    %74 = vector.broadcast %c2_i32_44 : i32 to vector<1x32xi32>
    %75 = arith.cmpi sge, %0, %74 : vector<1x32xi32>
    %cst_45 = arith.constant 0.000000e+00 : f32
    %76 = vector.shape_cast %75 : vector<1x32xi1> to vector<1x32xi1>
    %77 = vector.broadcast %76 : vector<1x32xi1> to vector<4x32xi1>
    %78 = vector.broadcast %cst_45 : f32 to vector<4x32xf32>
    %79 = arith.select %77, %73, %78 : vector<4x32xi1>, vector<4x32xf32>
    %c0_46 = arith.constant 0 : index
    %c0_47 = arith.constant 0 : index
    %c0_48 = arith.constant 0 : index
    %80 = vector.load %arg10[%c0_46, %c0_47, %c0_48] : memref<2x4x4xf32, #tpu.memory_space<vmem>>, vector<1x4x4xf32>
    %81 = vector.shape_cast %80 : vector<1x4x4xf32> to vector<4x4xf32>
    %cst_49 = arith.constant dense<0.000000e+00> : vector<4x32xf32>
    %82 = tpu.matmul %81, %79, %cst_49 {dimension_numbers = #tpu.dot_dimension_numbers<[1], [0], [0], [1], [0, 0, 1, 1], [], []>} : vector<4x4xf32>, vector<4x32xf32>, vector<4x32xf32> -> vector<4x32xf32>
    %c1_50 = arith.constant 1 : index
    %c0_51 = arith.constant 0 : index
    %c0_52 = arith.constant 0 : index
    %83 = vector.load %arg10[%c1_50, %c0_51, %c0_52] : memref<2x4x4xf32, #tpu.memory_space<vmem>>, vector<1x4x4xf32>
    %84 = vector.shape_cast %83 : vector<1x4x4xf32> to vector<4x4xf32>
    %cst_53 = arith.constant dense<0.000000e+00> : vector<4x32xf32>
    %85 = tpu.matmul %84, %70, %cst_53 {dimension_numbers = #tpu.dot_dimension_numbers<[1], [0], [0], [1], [0, 0, 1, 1], [], []>} : vector<4x4xf32>, vector<4x32xf32>, vector<4x32xf32> -> vector<4x32xf32>
    %86 = arith.addf %82, %85 : vector<4x32xf32>
    %c0_54 = arith.constant 0 : index
    %c0_55 = arith.constant 0 : index
    %87 = vector.load %arg11[%c0_54, %c0_55] : memref<4x1xf32, #tpu.memory_space<vmem>>, vector<4x1xf32>
    %88 = vector.broadcast %87 : vector<4x1xf32> to vector<4x32xf32>
    %89 = arith.addf %86, %88 : vector<4x32xf32>
    %cst_56 = arith.constant 0.000000e+00 : f32
    %90 = vector.broadcast %cst_56 : f32 to vector<4x32xf32>
    %91 = arith.maximumf %89, %90 : vector<4x32xf32>
    %92 = arith.addf %91, %49 : vector<4x32xf32>
    %cst_57 = arith.constant 0.000000e+00 : f32
    %93 = vector.broadcast %cst_57 : f32 to vector<4x32xf32>
    %94 = arith.maximumf %92, %93 : vector<4x32xf32>
    %c0_58 = arith.constant 0 : index
    %c0_59 = arith.constant 0 : index
    %95 = vector.load %arg12[%c0_58, %c0_59] : memref<4x32xf32, #tpu.memory_space<vmem>>, vector<4x32xf32>
    %c0_60 = arith.constant 0 : index
    %c0_61 = arith.constant 0 : index
    %96 = vector.load %arg13[%c0_60, %c0_61] : memref<32x2xf32, #tpu.memory_space<vmem>>, vector<32x2xf32>
    %c0_62 = arith.constant 0 : index
    %c0_63 = arith.constant 0 : index
    %97 = vector.load %arg14[%c0_62, %c0_63] : memref<1x1xf32, #tpu.memory_space<vmem>>, vector<1x1xf32>
    %98 = arith.mulf %94, %95 : vector<4x32xf32>
    %cst_64 = arith.constant dense<0.000000e+00> : vector<32xf32>
    %99 = vector.multi_reduction <add>, %98, %cst_64 [0] : vector<4x32xf32> to vector<32xf32>
    %100 = vector.shape_cast %99 : vector<32xf32> to vector<1x32xf32>
    %cst_65 = arith.constant dense<0.000000e+00> : vector<1x2xf32>
    %101 = tpu.matmul %100, %96, %cst_65 {dimension_numbers = #tpu.dot_dimension_numbers<[1], [0], [0], [1], [0, 0, 1, 1], [], []>} : vector<1x32xf32>, vector<32x2xf32>, vector<1x2xf32> -> vector<1x2xf32>
    %102 = vector.broadcast %97 : vector<1x1xf32> to vector<1x2xf32>
    %103 = arith.addf %101, %102 : vector<1x2xf32>
    %c0_66 = arith.constant 0 : index
    %c0_67 = arith.constant 0 : index
    %104 = vector.load %arg15[%c0_66, %c0_67] : memref<1x2xf32, #tpu.memory_space<vmem>>, vector<1x2xf32>
    tpu.vector_store %arg15[%c0_66, %c0_67], %103 {strides = array<i32>} : memref<1x2xf32, #tpu.memory_space<vmem>>, vector<1x2xf32>,
    return
  }
}

</mosaic_0001>

<bundles_post_ra>
// kernel: tile.7
= control target key start
LH: loop header
LB: loop body
LE: loop exit
PB: predicated region body
PF: predicated region fallthrough
CT: control target
= control target key end

     0   :  { %vm19_vm0 = vcmask 130048   ;;  %vm25_vm1 = vcmask 261248   ;;  %s63_s0 = inlined_call_operand.vmem [shape: f32[4,2,16], index: 0, kind: input, shape index: {}]   ;;  %s64_s1 = inlined_call_operand.vmem [shape: f32[4,32], index: 1, kind: output, shape index: {}]  }
   0x1   :  { %v33_v0 = vld [vmem:[%s63_s0 + $0x6] sm:$0x3]  ;;  %v34_v1 = vld [vmem:[%s63_s0 + $0x4] sm:$0x3]  ;;  %v35_v2 = vld [vmem:[%s63_s0 + $0x2] sm:$0x3] }
   0x2   :  { %7 = vst [vmem:[#allocation1 + $0x18] sm:$0x3] %v33_v0  ;;  %v16_v3 = vld [vmem:[%s63_s0] sm:$0x3]  ;;  %s37_s0 = smov 16  }
   0x3   :  { %11 = vst [vmem:[#allocation1 + $0x10] sm:$0x3] %v34_v1 }
   0x4   :  { %15 = vst [vmem:[#allocation1 + $0x8] sm:$0x3] %v35_v2 }
   0x5   :  { %17 = vst [vmem:[#allocation1] sm:$0x3] %v16_v3 }
   0xc   :  { %v22_v4 = vld [vmem:[#allocation1 + $0x1] ss:$8 sm:$0xf]   ;;  %v18_v5 = vld [vmem:[#allocation1] ss:$8 sm:$0xf]  }
   0xd   :  { %23 = vrot.lane.b32.xlu0 %v22_v4, %s37_s0  ;;  %20 = vst.msk [vmem:[#allocation0] sm:$0xf] %vm19_vm0, %v18_v5  }
  0x7f   :  { %v24_v6 = vpop.permute.xlu0 %23  }
  0x80   :  { %26 = vst.msk [vmem:[#allocation0] sm:$0xf] %vm25_vm1, %v24_v6  }
  0x87   :  { %v29_v7 = vld [vmem:[#allocation0] sm:$0xf] }
  0x88   :  { %32 = vst [vmem:[%s64_s1] sm:$0xf] %v29_v7 }

// kernel: fast_vth_search_block.1
= control target key start
LH: loop header
LB: loop body
LE: loop exit
PB: predicated region body
PF: predicated region fallthrough
CT: control target
= control target key end

     0   :  { %s753_s0 = inlined_call_operand.vmem [shape: s32[1,32], index: 0, kind: input, shape index: {}]   ;;  %s754_s1 = inlined_call_operand.vmem [shape: f32[1,32], index: 1, kind: input, shape index: {}]   ;;  %s755_s2 = inlined_call_operand.vmem [shape: f32[2,4,1], index: 2, kind: input, shape index: {}]   ;;  %s756_s3 = inlined_call_operand.vmem [shape: f32[4,1], index: 3, kind: input, shape index: {}]   ;;  %s757_s4 = inlined_call_operand.vmem [shape: f32[2,4,4], index: 4, kind: input, shape index: {}]   ;;  %s758_s5 = inlined_call_operand.vmem [shape: f32[4,1], index: 5, kind: input, shape index: {}]   ;;  %s759_s6 = inlined_call_operand.vmem [shape: f32[4,1], index: 6, kind: input, shape index: {}]   ;;  %s760_s7 = inlined_call_operand.vmem [shape: f32[4,1], index: 7, kind: input, shape index: {}]   ;;  %s761_s8 = inlined_call_operand.vmem [shape: f32[2,4,4], index: 8, kind: input, shape index: {}]   ;;  %s762_s9 = inlined_call_operand.vmem [shape: f32[4,1], index: 9, kind: input, shape index: {}]   ;;  %s763_s10 = inlined_call_operand.hbm [shape: f32[2,4,4], index: 10, kind: input, shape index: {}]   ;;  %s764_s11 = inlined_call_operand.vmem [shape: f32[4,1], index: 11, kind: input, shape index: {}]   ;;  %s765_s12 = inlined_call_operand.vmem [shape: f32[4,32], index: 12, kind: input, shape index: {}]   ;;  %s766_s13 = inlined_call_operand.vmem [shape: f32[32,2], index: 13, kind: input, shape index: {}]   ;;  %s767_s14 = inlined_call_operand.<no memory space> [shape: f32[1,1], index: 14, kind: input, shape index: {}]   ;;  %s768_s15 = inlined_call_operand.hbm [shape: f32[1,2], index: 15, kind: output, shape index: {}]  }
   0x1   :  { %v20_v0 = vstv %s767_s14 }
   0x2   :  { %21 = vst [vmem:[#allocation2] sm:$0x1] %v20_v0 }
   0x3   :  { %22 = vsyncpa [#allocation4], 0 }
   0x4   :  { %23 = vsyncpa [#allocation5], 0  ;;  %s48_s22 = sshll.u32 %s763_s10, 4  ;;  %s554_s23 = smov [#allocation3]   ;;  %s49_s22 = int_to_ptr.hbm [resolvable:$true] %s48_s22 }
   0x5   :  { %s50_s24 = sshll.u32 %s554_s23, 4  ;;  %s555_s25 = smov 64   ;;  %s51_s24 = int_to_ptr.vmem [resolvable:$true] %s50_s24 }
   0x6   :  { %s556_s26 = smov 4  }
   0x7   :  { %56 = dma.hbm_to_vmem [thread:$0]  %s49_s22, 128, %s51_s24, [#allocation4], %s555_s25, %s555_s25, %s556_s26  }
   0x8   :  { %550 = dma.done.wait [#allocation4], 128  }
   0x9   :  { %551 = vsyncadd [#allocation4], 4294967168  ;;  %v501_v1 = vld [vmem:[%s754_s1] ss:$0 sm:$0xff]  ;;  %s557_s14 = smov 97   ;;  %s558_s29 = smov 1  }
   0xa   :  { %73 = vrot.lane.b32.xlu0 %v501_v1, %s557_s14  ;;  %v70_v2 = vld [vmem:[%s754_s1] sm:$0x1]  ;;  %vm89_vm0 = vcmask 1040384   ;;  %vm79_vm1 = vcmask 7168   ;;  %v467_v3 = vld [vmem:[%s755_s2 + $0x4] sm:$0xf] }
   0xb   :  { %468 = vmatpush.msk.msra.mxu0 %vm89_vm0, %v70_v2  ;;  %v138_v4 = vld [vmem:[%s756_s3] sm:$0xf]  ;;  %v559_v5 = vmov 0   ;;  %vm165_vm3 = vcmask 1043456   ;;  %v472_v18 = vld [vmem:[%s757_s4 + $0x4] sm:$0xf] }
   0xc   :  { %469 = vmatmul.msk.f32.vlgmr.msra.gmra.mxu0 %vm79_vm1, %v467_v3  ;;  %498 = vset.pattern.permute.xlu1 %v559_v5  ;;  %v69_v7 = vld [vmem:[%s753_s0] sm:$0x1]  ;;  %vm161_vm4 = vcmask 31744   ;;  %v479_v42 = vld [vmem:[%s761_s8 + $0x4] sm:$0xf]  ;;  %vm261_vm7 = vcmask 15360  }
   0xd   :  { %477 = vmatpush.msk.msrb.mxu0 %vm89_vm0, %v70_v2  ;;  %500 = vset.pattern.permute.xlu0 %v559_v5  ;;  %vm81_vm2 = vcmp.ge.s32.totalorder %v69_v7, 1  ;;  %v83_v10 = vld [vmem:[%s755_s2] sm:$0xf]  ;;  %vm263_vm6 = vcmp.ge.s32.totalorder %v69_v7, 2  ;;  %v341_v58 = vld [vmem:[#allocation3 + $0x4] sm:$0xf] }
   0xe   :  { %141 = vperm.xlu1 %498, %v138_v4   ;;  %499 = vset.pattern.permute.xlu2 %v559_v5  ;;  %v222_v19 = vld [vmem:[%s759_s6] sm:$0xf]  ;;  %v154_v22 = vsel %vm81_vm2, 1, %v559_v5  ;;  %v264_v43 = vsel %vm263_vm6, 1, %v559_v5  ;;  %v407_v0 = vld [vmem:[%s766_s13 + $0x18] sm:$0xff]  ;;  %v405_v2 = vld [vmem:[%s766_s13 + $0x8] sm:$0xff] }
   0xf   :  { %v223_v20 = vld [vmem:[%s760_s7] sm:$0xf]  ;;  %v155_v23 = vperm.slane %v154_v22, 0  ;;  %s561_s7 = smov 98   ;;  %v265_v44 = vperm.slane %v264_v43, 0  ;;  %vm410_vm9 = vcmask 257024  }
  0x10   :  { %v214_v21 = vld [vmem:[%s758_s5] sm:$0xf]  ;;  %s560_s5 = smov 2   ;;  %vm424_vm10 = vcmask 261120   ;;  %s457_s25 = sshll.u32 %s768_s15, 4  ;;  %vm448_vm11 = vcmask 8192   ;;  %s458_s25 = int_to_ptr.hbm [resolvable:$true] %s457_s25 }
  0x11   :  { %vm156_vm5 = vcmp.eq.s32.totalorder %v155_v23, 1  ;;  %v158_v27 = vld [vmem:[%s757_s4] sm:$0xf]  ;;  %vm716_vm8 = vcmp.eq.s32.totalorder %v265_v44, 1 }
  0x12   :  { %76 = vrot.lane.b32.xlu0 %v501_v1, %s558_s29  ;;  %v322_v40 = vld [vmem:[%s762_s9] sm:$0xf]  ;;  %v406_v1 = vld [vmem:[%s766_s13 + $0x10] sm:$0xff] }
  0x13   :  { %v393_v41 = vld [vmem:[%s764_s11] sm:$0xf] }
  0x14   :  { %478 = vmatmul.msk.f32.vlgmr.msrb.gmra.mxu0 %vm79_vm1, %v222_v19  ;;  %v268_v49 = vld [vmem:[%s761_s8] sm:$0xf] }
  0x15   :  { %v408_v57 = vld [vmem:[#allocation2] sm:$0x1]  ;;  %v339_v62 = vld [vmem:[#allocation3] sm:$0xf] }
  0x16   :  { %v404_v3 = vld [vmem:[%s766_s13] sm:$0xff]  ;;  %s562_s13 = smov [#allocation6]  }
  0x17   :  { %s455_s3 = sshll.u32 %s562_s13, 4  ;;  %s456_s3 = int_to_ptr.vmem [resolvable:$true] %s455_s3 }
  0x1a   :  { %226 = vperm.xlu0 %500, %v223_v20  }
  0x7c   :  { %v74_v6 = vpop.permute.xlu0 %73 }
  0x80   :  { %v142_v14 = vpop.permute.xlu1 %141 }
  0x84   :  { %v77_v8 = vpop.permute.xlu0 %76 }
  0x85   :  { %v80_v9 = vsel %vm79_vm1, %v74_v6, %v77_v8 }
  0x86   :  { %v82_v11 = vsel %vm81_vm2, %v80_v9, 0.0 }
  0x87   :  { %470 = vmatpush.msk.msra.mxu1 %vm89_vm0, %v82_v11  ;;  %v403_v11 = vld [vmem:[%s765_s12] sm:$0xf] }
  0x88   :  { %471 = vmatmul.msk.f32.vlgmr.msra.gmra.mxu1 %vm79_vm1, %v83_v10 }
  0x89   :  { %v109_v12 = vpop.f32.mrf.mxu0 }
  0x8c   :  { %v227_v33 = vpop.permute.xlu0 %226 }
  0x91   :  { %v249_v31 = vpop.f32.mrf.mxu0 }
  0x92   :  { %v250_v36 = vadd.f32 %v249_v31, %v227_v33 }
 0x105   :  { %v135_v13 = vpop.f32.mrf.mxu1 }
 0x106   :  { %v136_v15 = vadd.f32 %v135_v13, %v109_v12 }
 0x108   :  { %v144_v16 = vadd.f32 %v142_v14, %v136_v15 }
 0x10a   :  { %v145_v17 = vmax.f32 %v144_v16, 0.0 }
 0x10c   :  { %150 = vrot.lane.b32.xlu2 %v145_v17, %s558_s29  ;;  %147 = vrot.lane.b32.xlu1 %v145_v17, %s557_s14 }
 0x10d   :  { %473 = vmatpush.msk.msra.mxu2 %vm165_vm3, %v145_v17 }
 0x10e   :  { %474 = vmatmul.msk.f32.vlgmr.msra.gmra.mxu2 %vm161_vm4, %v472_v18 }
 0x114   :  { %217 = vperm.xlu2 %499, %v214_v21  }
 0x166   :  { %v151_v24 = vpop.permute.xlu2 %150 }
 0x16e   :  { %v218_v30 = vpop.permute.xlu2 %217 }
 0x17e   :  { %v148_v25 = vpop.permute.xlu1 %147 }
 0x17f   :  { %v153_v26 = vsel %vm79_vm1, %v148_v25, %v151_v24 }
 0x180   :  { %v157_v28 = vsel %vm156_vm5, %v153_v26, 0.0 }
 0x181   :  { %475 = vmatpush.msk.msra.mxu3 %vm165_vm3, %v157_v28 }
 0x182   :  { %476 = vmatmul.msk.f32.vlgmr.msra.gmra.mxu3 %vm161_vm4, %v158_v27 }
 0x191   :  { %v185_v29 = vpop.f32.mrf.mxu2 }
 0x205   :  { %v211_v32 = vpop.f32.mrf.mxu3 }
 0x206   :  { %v212_v34 = vadd.f32 %v211_v32, %v185_v29 }
 0x208   :  { %v220_v35 = vadd.f32 %v218_v30, %v212_v34 }
 0x20a   :  { %v221_v37 = vmax.f32 %v220_v35, 0.0 }
 0x20c   :  { %v252_v38 = vadd.f32 %v250_v36, %v221_v37 }
 0x20e   :  { %v253_v39 = vmax.f32 %v252_v38, 0.0 }
 0x210   :  { %258 = vrot.lane.b32.xlu2 %v253_v39, %s560_s5  ;;  %255 = vrot.lane.b32.xlu1 %v253_v39, %s561_s7 }
 0x211   :  { %480 = vmatpush.msk.msrb.mxu1 %vm165_vm3, %v253_v39 }
 0x212   :  { %481 = vmatmul.msk.f32.vlgmr.msrb.gmra.mxu1 %vm161_vm4, %v479_v42 }
 0x213   :  { %440 = vmatpush.msra.mxu1 %v407_v0 }
 0x215   :  { %441 = vmatpush.msra.mxu1 %v406_v1 }
 0x217   :  { %442 = vmatpush.msra.mxu1 %v405_v2 }
 0x218   :  { %325 = vperm.xlu1 %498, %v322_v40  }
 0x219   :  { %443 = vmatpush.msra.mxu1 %v404_v3 }
 0x220   :  { %396 = vperm.xlu1 %498, %v393_v41  }
 0x26a   :  { %v259_v46 = vpop.permute.xlu2 %258 }
 0x282   :  { %v256_v47 = vpop.permute.xlu1 %255 }
 0x283   :  { %v262_v48 = vsel %vm261_vm7, %v256_v47, %v259_v46 }
 0x284   :  { %v267_v50 = vsel %vm716_vm8, %v262_v48, 0.0 }
 0x285   :  { %482 = vmatpush.msk.msrb.mxu2 %vm165_vm3, %v267_v50 }
 0x286   :  { %483 = vmatmul.msk.f32.vlgmr.msrb.gmra.mxu2 %vm161_vm4, %v268_v49 }
 0x28a   :  { %v326_v54 = vpop.permute.xlu1 %325 }
 0x28f   :  { %v293_v51 = vpop.f32.mrf.mxu1 }
 0x292   :  { %v397_v7 = vpop.permute.xlu1 %396 }
 0x309   :  { %v319_v52 = vpop.f32.mrf.mxu2 }
 0x30a   :  { %v320_v53 = vadd.f32 %v319_v52, %v293_v51 }
 0x30c   :  { %v328_v55 = vadd.f32 %v326_v54, %v320_v53 }
 0x30e   :  { %v329_v56 = vmax.f32 %v328_v55, 0.0 }
 0x310   :  { %334 = vrot.lane.b32.xlu0 %v329_v56, %s560_s5  ;;  %331 = vrot.lane.b32.xlu2 %v329_v56, %s561_s7 }
 0x311   :  { %484 = vmatpush.msk.msrb.mxu3 %vm165_vm3, %v329_v56 }
 0x312   :  { %485 = vmatmul.msk.f32.vlgmr.msrb.gmra.mxu3 %vm161_vm4, %v341_v58 }
 0x318   :  { %420 = vperm.xlu2 %499, %v408_v57  }
 0x36a   :  { %v332_v59 = vpop.permute.xlu2 %331 }
 0x372   :  { %v421_v21 = vpop.permute.xlu2 %420 }
 0x373   :  { %v423_v22 = vperm.slane %v421_v21, 0 }
 0x382   :  { %v335_v60 = vpop.permute.xlu0 %334 }
 0x383   :  { %v337_v61 = vsel %vm261_vm7, %v332_v59, %v335_v60 }
 0x384   :  { %v338_v63 = vsel %vm716_vm8, %v337_v61, 0.0 }
 0x385   :  { %486 = vmatpush.msk.msra.mxu0 %vm165_vm3, %v338_v63 }
 0x386   :  { %487 = vmatmul.msk.f32.vlgmr.msra.gmra.mxu0 %vm161_vm4, %v339_v62 }
 0x395   :  { %v364_v4 = vpop.f32.mrf.mxu3 }
 0x403   :  { %v390_v5 = vpop.f32.mrf.mxu0 }
 0x404   :  { %v391_v6 = vadd.f32 %v390_v5, %v364_v4 }
 0x406   :  { %v399_v8 = vadd.f32 %v397_v7, %v391_v6 }
 0x408   :  { %v400_v9 = vmax.f32 %v399_v8, 0.0 }
 0x40a   :  { %v401_v10 = vadd.f32 %v400_v9, %v253_v39 }
 0x40c   :  { %v402_v12 = vmax.f32 %v401_v10, 0.0 }
 0x40e   :  { %v409_v13 = vmul.f32 %v403_v11, %v402_v12 }
 0x410   :  { %v411_v14 = vsel %vm410_vm9, %v409_v13, 0.0 }
 0x411   :  { %v412_v15 = vrot.slane %v411_v14, 4 }
 0x413   :  { %v413_v16 = vadd.f32 %v412_v15, %v411_v14 }
 0x415   :  { %v414_v17 = vrot.slane %v413_v16, 2 }
 0x417   :  { %v415_v18 = vadd.f32 %v414_v17, %v413_v16 }
 0x419   :  { %v416_v19 = vrot.slane %v415_v18, 1 }
 0x41b   :  { %v417_v20 = vadd.f32 %v416_v19, %v415_v18 }
 0x41d   :  { %488 = vmatmul.msk.f32.vlgmr.msra.gmra.mxu1 %vm424_vm10, %v417_v20 }
 0x49a   :  { %v445_v23 = vpop.f32.mrf.mxu1 }
 0x49b   :  { %v446_v24 = vadd.f32 %v445_v23, %v423_v22 }
 0x49d   :  { %449 = vst.msk [vmem:[#allocation6] sm:$0x1] %vm448_vm11, %v446_v24 }
 0x49e   :  { %460 = dma.vmem_to_hbm [thread:$0]  %s456_s3, 16, %s458_s25, [#allocation5]  }
 0x49f   :  { %552 = dma.done.wait [#allocation5], 16  }
 0x4a0   :  { %553 = vsyncadd [#allocation5], 4294967280 }
 0x4a1   :  { %465 = vsyncpa [#allocation4], 1 }
 0x4a2   :  { %466 = vsyncpa [#allocation5], 1 }

</bundles_post_ra>
